<compile_context>
chip_gen: v7x
topology: tpu7x:2x2x1
jax: 0.10.0
libtpu: 0.0.40
codegen_flags: <defaults>
</compile_context>

<pallas_src>
import functools
import math

import jax
import jax.numpy as jnp
from jax import lax
from jax.experimental import pallas as pl
from jax.experimental.pallas import tpu as pltpu


def _round_up(x, m):
    return ((x + m - 1) // m) * m


def _physical_vmem_bytes():
    try:
        return int(pltpu.get_tpu_info().vmem_capacity_bytes)
    except Exception:
        return 64 * 1024 * 1024  # assume the smallest (v7x per-TensorCore)


def _smooth_label_loss_kernel(dec_ref, lab_ref, out_ref, *, n_rows,
                              need_sum_scores, use_mxu_reduce):
    # dec_ref: (tile_n, C) native dtype, lab_ref: (tile_n, 1) int32,
    # out_ref: (1, 8, 128) f32 per-tile partials block:
    #   [0,0,0] = sum of all scores, [0,0,1] = sum of picked scores,
    #   [0,0,2] = count of valid picked rows.
    pid = pl.program_id(0)

    x = dec_ref[...].astype(jnp.float32)          # (T, C) f32 upcast (budgeted)
    labels = lab_ref[...]                         # (T, 1) int32
    t, c = x.shape

    if use_mxu_reduce:
        # Offload class-axis sums to the otherwise idle MXU (matvec with ones).
        ones_c = jnp.ones((c, 1), jnp.float32)

        def _rowsum(y):
            return jnp.dot(y, ones_c, preferred_element_type=jnp.float32)
    else:
        def _rowsum(y):
            return jnp.sum(y, axis=-1, keepdims=True)

    # Numerically stable per-row log-partition: log_z = m + log(sum(exp(x-m))).
    m = jnp.max(x, axis=-1, keepdims=True)                        # (T, 1)
    log_z = m + jnp.log(_rowsum(jnp.exp(x - m)))                  # (T, 1)

    # x at each row's label position (one-hot select + lane reduction).
    col = lax.broadcasted_iota(jnp.int32, (t, c), 1)
    picked_x = _rowsum(jnp.where(col == labels, x, jnp.float32(0.0)))
    picked_score = picked_x - log_z                               # (T, 1)

    # Row validity: mask the ragged tail of the last tile (which read
    # undefined HBM padding) and out-of-range / ignore_index labels.
    # NOTE: keep these as jnp.where *selects*: they must stay NaN/Inf safe for
    # the garbage rows -- do not refactor them into multiplies by the mask.
    row = lax.broadcasted_iota(jnp.int32, (t, 1), 0) + pid * t
    valid_row = row < n_rows                                      # (T, 1)
    label_ok = jnp.logical_and(labels >= 0, labels < c)           # (T, 1)
    pick_mask = jnp.logical_and(valid_row, label_ok)

    s_pick = jnp.sum(jnp.where(pick_mask, picked_score, jnp.float32(0.0)))
    n_pick = jnp.sum(jnp.where(pick_mask, jnp.float32(1.0), jnp.float32(0.0)))

    if need_sum_scores:
        # sum_j scores[i, j] = sum_j x[i, j] - C * log_z[i]  (scores never built)
        row_scores = _rowsum(x) - jnp.float32(c) * log_z          # (T, 1)
        s_all = jnp.sum(jnp.where(valid_row, row_scores, jnp.float32(0.0)))
    else:
        s_all = jnp.float32(0.0)

    # Pack the three per-tile partials into the (8, 128)-aligned output block.
    sub = lax.broadcasted_iota(jnp.int32, (8, 128), 0)
    lane = lax.broadcasted_iota(jnp.int32, (8, 128), 1)
    blk = jnp.where(jnp.logical_and(sub == 0, lane == 0), s_all, jnp.float32(0.0))
    blk = jnp.where(jnp.logical_and(sub == 0, lane == 1), s_pick, blk)
    blk = jnp.where(jnp.logical_and(sub == 0, lane == 2), n_pick, blk)
    out_ref[0] = blk


def smooth_label_criterion(dec_outs, labels, label_smoothing=0.0,
                           max_rows_per_block=None):
    """Pallas TPU implementation of SmoothLabelCritierion.forward.

    dec_outs: [N, C] float array (any float dtype), labels: [N] int array.
    Returns a scalar f32 loss.  Labels outside [0, C) (e.g. -100 padding) are
    ignored in the NLL path, matching PyTorch's NLLLoss ignore_index.
    """
    n, c = dec_outs.shape
    ls = float(label_smoothing)
    if ls > 0.0 and c < 2:
        raise ValueError("label_smoothing > 0 requires at least 2 classes")

    labels_col = labels.reshape(n, 1).astype(jnp.int32)

    itemsize = jnp.dtype(dec_outs.dtype).itemsize
    # Dtype-aware row alignment: native sublane packing is (8,128) for f32,
    # (16,128) for bf16, (32,128) for 8-bit types.
    row_mult = {4: 8, 2: 16, 1: 32}.get(itemsize, 8)

    # Budget the *live* VMEM footprint: 2x double-buffered input block plus the
    # (tile_n, C) f32 upcast temporary materialized inside the kernel.
    vmem_phys = _physical_vmem_bytes()
    live_budget = min(int(vmem_phys * 0.40), 48 * 1024 * 1024)
    per_row_bytes = c * (2 * itemsize + 4)
    cap_rows = (live_budget // max(1, per_row_bytes)) // row_mult * row_mult
    cap_rows = max(row_mult, cap_rows)
    if max_rows_per_block is not None:
        cap_rows = min(cap_rows,
                       max(row_mult, (max_rows_per_block // row_mult) * row_mult))
    tile_n = min(_round_up(n, row_mult), cap_rows)
    grid_n = (n + tile_n - 1) // tile_n

    vmem_limit = max(32 * 1024 * 1024,
                     min(vmem_phys * 3 // 4, 96 * 1024 * 1024))

    kernel = functools.partial(
        _smooth_label_loss_kernel,
        n_rows=n,
        need_sum_scores=(ls > 0.0),
        use_mxu_reduce=(c >= 128))

    cost = pl.CostEstimate(
        flops=8 * n * c,
        transcendentals=n * c,
        bytes_accessed=n * c * itemsize + 4 * n + grid_n * 8 * 128 * 4)

    partials = pl.pallas_call(
        kernel,
        out_shape=jax.ShapeDtypeStruct((grid_n, 8, 128), jnp.float32),
        grid=(grid_n,),
        in_specs=[
            pl.BlockSpec((tile_n, c), lambda i: (i, 0)),   # dec_outs row tile
            pl.BlockSpec((tile_n, 1), lambda i: (i, 0)),   # labels column tile
        ],
        out_specs=pl.BlockSpec((1, 8, 128), lambda i: (i, 0, 0)),
        compiler_params=pltpu.CompilerParams(
            dimension_semantics=("parallel",),
            vmem_limit_bytes=int(vmem_limit)),
        cost_estimate=cost,
    )(dec_outs, labels_col)

    # Tree-reduce the per-tile partials (megacore-friendly, better f32 accuracy
    # than one running scalar accumulated across the whole grid).
    sum_scores = jnp.sum(partials[:, 0, 0])   # sum_{i,j} log_softmax(x)[i, j]
    sum_picked = jnp.sum(partials[:, 0, 1])   # sum_i   log_softmax(x)[i, labels[i]]
    num_picked = jnp.sum(partials[:, 0, 2])   # number of valid (non-ignored) rows

    if ls > 0.0:
        confidence = 1.0 - ls
        smooth_val = ls / (c - 1)
        # Entropy-like constant sum_j t_j * log(t_j) per row (0*log0 := 0).
        ent = 0.0
        if confidence > 0.0:
            ent += confidence * math.log(confidence)
        if smooth_val > 0.0:
            ent += (c - 1) * smooth_val * math.log(smooth_val)
        cross = smooth_val * sum_scores + (confidence - smooth_val) * sum_picked
        # KLDivLoss(reduction='batchmean') = [N*ent - cross] / N
        return jnp.float32(ent) - cross / jnp.float32(n)
    # NLLLoss (mean over non-ignored rows).
    return -sum_picked / num_picked


def _reference(dec_outs, labels, label_smoothing):
    # Pure-JAX reference mirroring the PyTorch module (+ ignore_index for NLL).
    scores = jax.nn.log_softmax(dec_outs.astype(jnp.float32), axis=1)
    n, c = dec_outs.shape
    if label_smoothing > 0.0:
        confidence = 1.0 - label_smoothing
        target = jnp.full((n, c), label_smoothing / (c - 1), jnp.float32)
        target = target.at[jnp.arange(n), labels].set(confidence)
        return jnp.sum(target * (jnp.log(target) - scores)) / n
    valid = labels >= 0
    safe = jnp.where(valid, labels, 0)
    picked = scores[jnp.arange(n), safe]
    return -jnp.sum(jnp.where(valid, picked, 0.0)) / jnp.sum(valid)


if __name__ == "__main__":
    key = jax.random.PRNGKey(0)
    k1, k2, k3, k4, k5, k6 = jax.random.split(key, 6)

    # Case 1: f32, single tile, with and without label smoothing.
    N, C = 16, 32
    ls = 0.1
    dec = jax.random.normal(k1, (N, C), dtype=jnp.float32)
    lab = jax.random.randint(k2, (N,), 0, C, dtype=jnp.int32)
    loss_kl = jax.block_until_ready(smooth_label_criterion(dec, lab, ls))
    loss_nll = jax.block_until_ready(smooth_label_criterion(dec, lab, 0.0))
    ref_kl = _reference(dec, lab, ls)
    ref_nll = _reference(dec, lab, 0.0)
    assert jnp.allclose(loss_kl, ref_kl, rtol=1e-4, atol=1e-5), (loss_kl, ref_kl)
    assert jnp.allclose(loss_nll, ref_nll, rtol=1e-4, atol=1e-5), (loss_nll, ref_nll)

    # Case 2: bf16 input (kernel upcasts in VMEM), N not a multiple of 16.
    N2, C2 = 13, 32
    dec2 = jax.random.normal(k3, (N2, C2), dtype=jnp.bfloat16)
    lab2 = jax.random.randint(k4, (N2,), 0, C2, dtype=jnp.int32)
    loss2 = jax.block_until_ready(smooth_label_criterion(dec2, lab2, ls))
    ref2 = _reference(dec2, lab2, ls)
    assert jnp.allclose(loss2, ref2, rtol=1e-4, atol=1e-4), (loss2, ref2)

    # Case 3: multi-tile parallel grid with ragged tail + MXU lane-reduction
    # path (C >= 128); row blocks forced small to exercise the partial sums.
    N3, C3 = 200, 384
    dec3 = jax.random.normal(k5, (N3, C3), dtype=jnp.float32)
    lab3 = jax.random.randint(k6, (N3,), 0, C3, dtype=jnp.int32)
    loss3 = jax.block_until_ready(
        smooth_label_criterion(dec3, lab3, ls, max_rows_per_block=64))
    ref3 = _reference(dec3, lab3, ls)
    assert jnp.allclose(loss3, ref3, rtol=2e-4, atol=1e-4), (loss3, ref3)

    # Case 4: NLL path with PyTorch-style ignore_index (-100) padding labels.
    lab4 = lab3.at[::7].set(-100)
    loss4 = jax.block_until_ready(
        smooth_label_criterion(dec3, lab4, 0.0, max_rows_per_block=64))
    ref4 = _reference(dec3, lab4, 0.0)
    assert jnp.allclose(loss4, ref4, rtol=1e-4, atol=1e-5), (loss4, ref4)

    print("KERNEL_OK")
</pallas_src>

<mosaic_0001>
module attributes {stable_mosaic.version = 11 : i64} {
  func.func @_smooth_label_loss_kernel(%arg0: i32, %arg1: memref<16x32xf32, #tpu.memory_space<vmem>>, %arg2: memref<16x1xi32, #tpu.memory_space<vmem>>, %arg3: memref<1x8x128xf32, #tpu.memory_space<vmem>>) attributes {dimension_semantics = [#tpu.dimension_semantics<parallel>], iteration_bounds = array<i64: 1>, scalar_prefetch = 0 : i64, scratch_operands = 0 : i64, tpu.core_type = #tpu.core_type<tc>, window_params = [{transform_indices = @transform_0, window_bounds = array<i64: 16, 32>}, {transform_indices = @transform_1, window_bounds = array<i64: 16, 1>}, {transform_indices = @transform_2, window_bounds = array<i64: 1, 8, 128>}]} {
    %c0 = arith.constant 0 : index
    %c0_0 = arith.constant 0 : index
    %0 = vector.load %arg1[%c0, %c0_0] : memref<16x32xf32, #tpu.memory_space<vmem>>, vector<16x32xf32>
    %c0_1 = arith.constant 0 : index
    %c0_2 = arith.constant 0 : index
    %1 = vector.load %arg2[%c0_1, %c0_2] : memref<16x1xi32, #tpu.memory_space<vmem>>, vector<16x1xi32>
    %cst = arith.constant dense<0xFF800000> : vector<16xf32>
    %2 = vector.multi_reduction <maximumf>, %0, %cst [1] : vector<16x32xf32> to vector<16xf32>
    %3 = vector.shape_cast %2 : vector<16xf32> to vector<16x1xf32>
    %4 = vector.broadcast %3 : vector<16x1xf32> to vector<16x32xf32>
    %5 = arith.subf %0, %4 : vector<16x32xf32>
    %6 = math.exp %5 : vector<16x32xf32>
    %cst_3 = arith.constant dense<0.000000e+00> : vector<16xf32>
    %7 = vector.multi_reduction <add>, %6, %cst_3 [1] : vector<16x32xf32> to vector<16xf32>
    %8 = vector.shape_cast %7 : vector<16xf32> to vector<16x1xf32>
    %9 = math.log %8 : vector<16x1xf32>
    %10 = arith.addf %3, %9 : vector<16x1xf32>
    %11 = tpu.iota {dimensions = array<i32: 1>} : vector<16x32xi32>
    %12 = vector.broadcast %1 : vector<16x1xi32> to vector<16x32xi32>
    %13 = arith.cmpi eq, %11, %12 : vector<16x32xi32>
    %cst_4 = arith.constant 0.000000e+00 : f32
    %14 = vector.broadcast %cst_4 : f32 to vector<16x32xf32>
    %15 = arith.select %13, %0, %14 : vector<16x32xi1>, vector<16x32xf32>
    %cst_5 = arith.constant dense<0.000000e+00> : vector<16xf32>
    %16 = vector.multi_reduction <add>, %15, %cst_5 [1] : vector<16x32xf32> to vector<16xf32>
    %17 = vector.shape_cast %16 : vector<16xf32> to vector<16x1xf32>
    %18 = arith.subf %17, %10 : vector<16x1xf32>
    %19 = tpu.iota {dimensions = array<i32: 0>} : vector<16x1xi32>
    %c16_i32 = arith.constant 16 : i32
    %20 = arith.muli %arg0, %c16_i32 : i32
    %21 = vector.broadcast %20 : i32 to vector<16x1xi32>
    %22 = arith.addi %19, %21 : vector<16x1xi32>
    %c16_i32_6 = arith.constant 16 : i32
    %23 = vector.broadcast %c16_i32_6 : i32 to vector<16x1xi32>
    %24 = arith.cmpi slt, %22, %23 : vector<16x1xi32>
    %c0_i32 = arith.constant 0 : i32
    %25 = vector.broadcast %c0_i32 : i32 to vector<16x1xi32>
    %26 = arith.cmpi sge, %1, %25 : vector<16x1xi32>
    %c32_i32 = arith.constant 32 : i32
    %27 = vector.broadcast %c32_i32 : i32 to vector<16x1xi32>
    %28 = arith.cmpi slt, %1, %27 : vector<16x1xi32>
    %29 = arith.andi %26, %28 : vector<16x1xi1>
    %30 = arith.andi %24, %29 : vector<16x1xi1>
    %cst_7 = arith.constant 0.000000e+00 : f32
    %31 = vector.broadcast %cst_7 : f32 to vector<16x1xf32>
    %32 = arith.select %30, %18, %31 : vector<16x1xi1>, vector<16x1xf32>
    %33 = vector.shape_cast %32 : vector<16x1xf32> to vector<1x16x1xf32>
    %cst_8 = arith.constant dense<0.000000e+00> : vector<1xf32>
    %34 = vector.multi_reduction <add>, %33, %cst_8 [1, 2] : vector<1x16x1xf32> to vector<1xf32>
    %35 = vector.shape_cast %34 : vector<1xf32> to vector<1x1x1xf32>
    %36 = vector.extract %35[0, 0, 0] : f32 from vector<1x1x1xf32>
    %cst_9 = arith.constant 1.000000e+00 : f32
    %cst_10 = arith.constant 0.000000e+00 : f32
    %37 = vector.broadcast %cst_9 : f32 to vector<16x1xf32>
    %38 = vector.broadcast %cst_10 : f32 to vector<16x1xf32>
    %39 = arith.select %30, %37, %38 : vector<16x1xi1>, vector<16x1xf32>
    %40 = vector.shape_cast %39 : vector<16x1xf32> to vector<1x16x1xf32>
    %cst_11 = arith.constant dense<0.000000e+00> : vector<1xf32>
    %41 = vector.multi_reduction <add>, %40, %cst_11 [1, 2] : vector<1x16x1xf32> to vector<1xf32>
    %42 = vector.shape_cast %41 : vector<1xf32> to vector<1x1x1xf32>
    %43 = vector.extract %42[0, 0, 0] : f32 from vector<1x1x1xf32>
    %cst_12 = arith.constant dense<0.000000e+00> : vector<16xf32>
    %44 = vector.multi_reduction <add>, %0, %cst_12 [1] : vector<16x32xf32> to vector<16xf32>
    %45 = vector.shape_cast %44 : vector<16xf32> to vector<16x1xf32>
    %cst_13 = arith.constant 3.200000e+01 : f32
    %46 = vector.broadcast %cst_13 : f32 to vector<16x1xf32>
    %47 = arith.mulf %46, %10 : vector<16x1xf32>
    %48 = arith.subf %45, %47 : vector<16x1xf32>
    %cst_14 = arith.constant 0.000000e+00 : f32
    %49 = vector.broadcast %cst_14 : f32 to vector<16x1xf32>
    %50 = arith.select %24, %48, %49 : vector<16x1xi1>, vector<16x1xf32>
    %51 = vector.shape_cast %50 : vector<16x1xf32> to vector<1x16x1xf32>
    %cst_15 = arith.constant dense<0.000000e+00> : vector<1xf32>
    %52 = vector.multi_reduction <add>, %51, %cst_15 [1, 2] : vector<1x16x1xf32> to vector<1xf32>
    %53 = vector.shape_cast %52 : vector<1xf32> to vector<1x1x1xf32>
    %54 = vector.extract %53[0, 0, 0] : f32 from vector<1x1x1xf32>
    %55 = tpu.iota {dimensions = array<i32: 0>} : vector<8x128xi32>
    %56 = tpu.iota {dimensions = array<i32: 1>} : vector<8x128xi32>
    %c0_i32_16 = arith.constant 0 : i32
    %57 = vector.broadcast %c0_i32_16 : i32 to vector<8x128xi32>
    %58 = arith.cmpi eq, %55, %57 : vector<8x128xi32>
    %c0_i32_17 = arith.constant 0 : i32
    %59 = vector.broadcast %c0_i32_17 : i32 to vector<8x128xi32>
    %60 = arith.cmpi eq, %56, %59 : vector<8x128xi32>
    %61 = arith.andi %58, %60 : vector<8x128xi1>
    %cst_18 = arith.constant 0.000000e+00 : f32
    %62 = vector.broadcast %54 : f32 to vector<8x128xf32>
    %63 = vector.broadcast %cst_18 : f32 to vector<8x128xf32>
    %64 = arith.select %61, %62, %63 : vector<8x128xi1>, vector<8x128xf32>
    %c0_i32_19 = arith.constant 0 : i32
    %65 = vector.broadcast %c0_i32_19 : i32 to vector<8x128xi32>
    %66 = arith.cmpi eq, %55, %65 : vector<8x128xi32>
    %c1_i32 = arith.constant 1 : i32
    %67 = vector.broadcast %c1_i32 : i32 to vector<8x128xi32>
    %68 = arith.cmpi eq, %56, %67 : vector<8x128xi32>
    %69 = arith.andi %66, %68 : vector<8x128xi1>
    %70 = vector.broadcast %36 : f32 to vector<8x128xf32>
    %71 = arith.select %69, %70, %64 : vector<8x128xi1>, vector<8x128xf32>
    %c0_i32_20 = arith.constant 0 : i32
    %72 = vector.broadcast %c0_i32_20 : i32 to vector<8x128xi32>
    %73 = arith.cmpi eq, %55, %72 : vector<8x128xi32>
    %c2_i32 = arith.constant 2 : i32
    %74 = vector.broadcast %c2_i32 : i32 to vector<8x128xi32>
    %75 = arith.cmpi eq, %56, %74 : vector<8x128xi32>
    %76 = arith.andi %73, %75 : vector<8x128xi1>
    %77 = vector.broadcast %43 : f32 to vector<8x128xf32>
    %78 = arith.select %76, %77, %71 : vector<8x128xi1>, vector<8x128xf32>
    %c0_21 = arith.constant 0 : index
    %c0_22 = arith.constant 0 : index
    %c0_23 = arith.constant 0 : index
    %79 = vector.load %arg3[%c0_21, %c0_22, %c0_23] : memref<1x8x128xf32, #tpu.memory_space<vmem>>, vector<1x8x128xf32>
    %80 = vector.shape_cast %79 : vector<1x8x128xf32> to vector<8x128xf32>
    %81 = vector.shape_cast %78 : vector<8x128xf32> to vector<1x8x128xf32>
    tpu.vector_store %arg3[%c0_21, %c0_22, %c0_23], %81 {strides = array<i32>} : memref<1x8x128xf32, #tpu.memory_space<vmem>>, vector<1x8x128xf32>,
    return
  }
  func.func @transform_0(%arg0: i32) -> (i32, i32) {
    %c0_i32 = arith.constant 0 : i32
    %c0_i32_0 = arith.constant 0 : i32
    return %arg0, %c0_i32 : i32, i32
  }
  func.func @transform_1(%arg0: i32) -> (i32, i32) {
    %c0_i32 = arith.constant 0 : i32
    %c0_i32_0 = arith.constant 0 : i32
    return %arg0, %c0_i32 : i32, i32
  }
  func.func @transform_2(%arg0: i32) -> (i32, i32, i32) {
    %c0_i32 = arith.constant 0 : i32
    %c0_i32_0 = arith.constant 0 : i32
    %c0_i32_1 = arith.constant 0 : i32
    return %arg0, %c0_i32, %c0_i32_0 : i32, i32, i32
  }
}

</mosaic_0001>

<bundles_post_ra>
// kernel: tpu_custom_call.1
= control target key start
LH: loop header
LB: loop body
LE: loop exit
PB: predicated region body
PF: predicated region fallthrough
CT: control target
= control target key end

     0   :  { %vm16_vm0 = vcmask 261120   ;;  %v202_v4 = vmov 0   ;;  %s283_s0 = inlined_call_operand.vmem [shape: f32[16,32], index: 0, kind: input, shape index: {}]   ;;  %s284_s1 = inlined_call_operand.vmem [shape: s32[16,1], index: 1, kind: input, shape index: {}]   ;;  %s285_s2 = inlined_call_operand.hbm [shape: f32[1,8,128], index: 2, kind: output, shape index: {}]  }
   0x1   :  { %v12_v0 = vld [vmem:[%s283_s0] sm:$0xff]  ;;  %v13_v1 = vld [vmem:[%s283_s0 + $0x8] sm:$0xff]  ;;  %168 = vset.pattern.permute.xlu1 %v202_v4  ;;  %169 = vset.pattern.permute.xlu0 %v202_v4 }
   0x2   :  { %v14_v2 = vld [vmem:[%s284_s1] sm:$0xff]  ;;  %v17_v3 = vsel %vm16_vm0, %v12_v0, -inf }
   0x3   :  { %18 = vmax.xlane.f32.xlu0 %v17_v3  ;;  %44 = vperm.xlu1 %168, %v14_v2  }
   0x4   :  { %7 = vsyncpa [#allocation3], 0  ;;  %v20_v5 = vsel %vm16_vm0, %v13_v1, -inf  ;;  %v15_v6 = vld [vmem:[%s284_s1 + $0x8] sm:$0xff]  ;;  %v41_v11 = vlaneseq  ;;  %v107_v25 = vsel %vm16_vm0, %v12_v0, 0.0  ;;  %v110_v26 = vsel %vm16_vm0, %v13_v1, 0.0 }
   0x5   :  { %vm70_vm3 = vcmp.ge.s32.totalorder %v14_v2, 0  ;;  %vm72_vm4 = vcmp.lt.s32.totalorder %v14_v2, 32  ;;  %vm71_vm5 = vcmp.ge.s32.totalorder %v15_v6, 0  ;;  %vm73_vm6 = vcmp.lt.s32.totalorder %v15_v6, 32  ;;  %s204_s18 = smov [#allocation2]  }
   0x6   :  { %v235_v15 = vand.u32 127, %v41_v11  ;;  %vm245_vm7 = vmand %vm70_vm3, %vm72_vm4  ;;  %vm80_vm9 = vcmask 7168   ;;  %v203_v29 = vmov 0.0   ;;  %s151_s19 = sshll.u32 %s204_s18, 4  ;;  %s152_s19 = int_to_ptr.vmem [resolvable:$true] %s151_s19 }
   0x7   :  { %21 = vmax.xlane.f32.xlu0 %v20_v5  ;;  %47 = vperm.xlu1 %168, %v15_v6   ;;  %vm249_vm8 = vmand %vm71_vm5, %vm73_vm6  ;;  %v93_v30 = vsel %vm245_vm7, 1.0, %v203_v29  ;;  %s178_s20 = scalar_lea.vmem %s152_s19, 128  ;;  %p183_p1 = scmp.lt.s32.totalorder %s152_s19, %s152_s19 }
   0x8   :  { %v94_v31 = vsel %vm249_vm8, 1.0, %v203_v29  ;;  %v95_v32 = vsel %vm80_vm9, %v93_v30, 0.0  ;;  %vm132_vm11 = vcmp.eq.s32.totalorder %v235_v15, 0  ;;  %vm136_vm12 = vcmp.eq.s32.totalorder %v235_v15, 1  ;;  %p179_p0 = scmp.ne.s32.totalorder %s152_s19, %s178_s20  ;;  %p184_p2 = scmp.lt.s32.totalorder %s178_s20, %s178_s20 }
   0x9   :  { %v96_v33 = vsel %vm80_vm9, %v94_v31, 0.0  ;;  %vm140_vm13 = vcmp.eq.s32.totalorder %v235_v15, 2 }
   0xa   :  { %v97_v34 = vadd.f32 %v96_v33, %v95_v32  ;;  %p185_p3 = por %p184_p2, %p183_p1 }
   0xc   :  { %p186_p4 = pnand %p185_p3, %p179_p0 }
  0x82   :  { %v45_v14 = vpop.permute.xlu1 %44 }
  0x83   :  { %vm49_vm1 = vcmp.eq.s32.totalorder %v235_v15, %v45_v14 }
  0x84   :  { %v51_v18 = vsel %vm49_vm1, %v12_v0, 0.0 }
  0x85   :  { %v53_v20 = vsel %vm16_vm0, %v51_v18, 0.0 }
  0x86   :  { %v48_v16 = vpop.permute.xlu1 %47 }
  0x87   :  { %vm50_vm2 = vcmp.eq.s32.totalorder %v235_v15, %v48_v16 }
  0x88   :  { %v52_v22 = vsel %vm50_vm2, %v13_v1, 0.0 }
  0x89   :  { %v56_v24 = vsel %vm16_vm0, %v52_v22, 0.0 }
  0x90   :  { %v19_v7 = vpop.xlane.xlu0 %18 }
  0x91   :  { %v23_v8 = vsub.f32 %v12_v0, %v19_v7 }
  0x93   :  { %v25_v9 = vmul.f32 1.442695, %v23_v8 }
  0x94   :  { %v22_v10 = vpop.xlane.xlu0 %21 }
  0x95   :  { %170 = vpow2.f32 %v25_v9  ;;  %v24_v12 = vsub.f32 %v13_v1, %v22_v10 }
  0x97   :  { %v27_v13 = vmul.f32 1.442695, %v24_v12 }
  0x99   :  { %172 = vpow2.f32 %v27_v13 }
  0x9f   :  { %v171_v17 = vpop.eup %170 }
  0xa0   :  { %v29_v19 = vsel %vm16_vm0, %v171_v17, 0.0 }
  0xa1   :  { %30 = vadd.xlane.f32.xlu0 %v29_v19 }
  0xa3   :  { %v173_v21 = vpop.eup %172 }
  0xa4   :  { %v32_v23 = vsel %vm16_vm0, %v173_v21, 0.0 }
  0xa5   :  { %33 = vadd.xlane.f32.xlu1 %v32_v23  ;;  %54 = vadd.xlane.f32.xlu0 %v53_v20  ;;  %v62_v20 = vshrl.u32 %v41_v11, 7 }
  0xa7   :  { %vm131_vm10 = vcmp.eq.s32.totalorder %v62_v20, 0 }
  0xa8   :  { %vm133_vm14 = vmand %vm131_vm10, %vm132_vm11 }
  0xa9   :  { %57 = vadd.xlane.f32.xlu0 %v56_v24  ;;  %vm137_vm15 = vmand %vm131_vm10, %vm136_vm12 }
  0xaa   :  { %vm141_vm0 = vmand %vm131_vm10, %vm140_vm13 }
  0xad   :  { %108 = vadd.xlane.f32.xlu0 %v107_v25 }
  0xb1   :  { %111 = vadd.xlane.f32.xlu0 %v110_v26 }
  0xb5   :  { %98 = vadd.xlane.f32.xlu0 %v97_v34 }
 0x12e   :  { %v31_v35 = vpop.xlane.xlu0 %30 }
 0x12f   :  { %174 = vlog2.f32 %v31_v35 }
 0x132   :  { %v34_v36 = vpop.xlane.xlu1 %33  ;;  %v55_v37 = vpop.xlane.xlu0 %54 }
 0x133   :  { %176 = vlog2.f32 %v34_v36 }
 0x136   :  { %v58_v38 = vpop.xlane.xlu0 %57 }
 0x139   :  { %v175_v39 = vpop.eup %174 }
 0x13a   :  { %v36_v40 = vmul.f32 0.6931472, %v175_v39  ;;  %v109_v41 = vpop.xlane.xlu0 %108 }
 0x13c   :  { %v39_v42 = vadd.f32 %v36_v40, %v19_v7 }
 0x13d   :  { %v177_v43 = vpop.eup %176 }
 0x13e   :  { %v38_v44 = vmul.f32 0.6931472, %v177_v43  ;;  %v59_v45 = vsub.f32 %v55_v37, %v39_v42  ;;  %v113_v47 = vmul.f32 32.0, %v39_v42  ;;  %v112_v48 = vpop.xlane.xlu0 %111 }
 0x140   :  { %v40_v46 = vadd.f32 %v38_v44, %v22_v10  ;;  %v78_v49 = vsel %vm245_vm7, %v59_v45, 0.0  ;;  %v115_v54 = vsub.f32 %v109_v41, %v113_v47 }
 0x141   :  { %v81_v55 = vsel %vm80_vm9, %v78_v49, 0.0 }
 0x142   :  { %v60_v50 = vsub.f32 %v58_v38, %v40_v46  ;;  %v114_v51 = vmul.f32 32.0, %v40_v46  ;;  %v119_v59 = vsel %vm80_vm9, %v115_v54, 0.0  ;;  %v99_v61 = vpop.xlane.xlu0 %98 }
 0x143   :  { %v100_v62 = vrot.slane %v99_v61, 4 }
 0x144   :  { %v79_v52 = vsel %vm249_vm8, %v60_v50, 0.0  ;;  %v116_v53 = vsub.f32 %v112_v48, %v114_v51 }
 0x145   :  { %v82_v56 = vsel %vm80_vm9, %v79_v52, 0.0  ;;  %v101_v63 = vadd.f32 %v100_v62, %v99_v61 }
 0x146   :  { %v83_v57 = vadd.f32 %v82_v56, %v81_v55  ;;  %v120_v58 = vsel %vm80_vm9, %v116_v53, 0.0 }
 0x147   :  { %v121_v60 = vadd.f32 %v120_v58, %v119_v59  ;;  %v102_v0 = vrot.slane %v101_v63, 2 }
 0x148   :  { %84 = vadd.xlane.f32.xlu0 %v83_v57 }
 0x149   :  { %v103_v5 = vadd.f32 %v102_v0, %v101_v63 }
 0x14b   :  { %v104_v10 = vrot.slane %v103_v5, 1 }
 0x14c   :  { %122 = vadd.xlane.f32.xlu0 %v121_v60 }
 0x14d   :  { %v105_v17 = vadd.f32 %v104_v10, %v103_v5 }
 0x1d5   :  { %v85_v1 = vpop.xlane.xlu0 %84 }
 0x1d6   :  { %v86_v2 = vrot.slane %v85_v1, 4 }
 0x1d8   :  { %v87_v3 = vadd.f32 %v86_v2, %v85_v1 }
 0x1d9   :  { %v123_v4 = vpop.xlane.xlu0 %122 }
 0x1da   :  { %v88_v6 = vrot.slane %v87_v3, 2  ;;  %v124_v7 = vrot.slane %v123_v4, 4 }
 0x1dc   :  { %v125_v8 = vadd.f32 %v124_v7, %v123_v4  ;;  %v89_v9 = vadd.f32 %v88_v6, %v87_v3 }
 0x1de   :  { %v126_v12 = vrot.slane %v125_v8, 2  ;;  %v90_v13 = vrot.slane %v89_v9, 1 }
 0x1e0   :  { %v127_v14 = vadd.f32 %v126_v12, %v125_v8  ;;  %v91_v16 = vadd.f32 %v90_v13, %v89_v9 }
 0x1e2   :  { %159 = vpush %v91_v16  ;;  %v128_v18 = vrot.slane %v127_v14, 1 }
 0x1e3   :  { %161 = vpush %v105_v17 }
 0x1e4   :  { %v129_v19 = vadd.f32 %v128_v18, %v127_v14 }
 0x1e6   :  { %163 = vpush %v129_v19 }
 0x213   :  { %s160_s0 = spop %159 }
 0x214   :  { %s162_s1 = spop %161  ;;  %v138_v22 = vstv %s160_s0 }
 0x215   :  { %v142_v24 = vstv %s162_s1 }
 0x217   :  { %s164_s17 = spop %163 }
 0x218   :  { %v134_v21 = vstv %s164_s17 }
 0x219   :  { %v135_v23 = vsel %vm133_vm14, %v134_v21, 0.0 }
 0x21a   :  { %v139_v11 = vsel %vm137_vm15, %v138_v22, %v135_v23 }
 0x21b   :  { %v143_v25 = vsel %vm141_vm0, %v142_v24, %v139_v11 }
 0x21c   :  { %144 = vst [vmem:[#allocation2] sm:$0xff] %v143_v25 }
 0x21d   :  { %189 = shalt.err (!%p186_p4)
}
 0x21e   :  { %s190_s23 = scalar_lea.hbm %s285_s2, 128 }
 0x21f   :  { %p191_p5 = scmp.ne.s32.totalorder %s285_s2, %s190_s23  ;;  %p194_p6 = scmp.lt.u32.totalorder %s190_s23, %s285_s2 }
 0x221   :  { %p196_p7 = pnand %p194_p6, %p191_p5 }
 0x223   :  { %199 = shalt.err (!%p196_p7)
}
 0x224   :  { %154 = dma.vmem_to_hbm [thread:$0]  %s152_s19, 128, %s285_s2, [#allocation3]  }
 0x225   :  { %200 = dma.done.wait [#allocation3], 128  }
 0x226   :  { %201 = vsyncadd [#allocation3], 4294967168 }
 0x227   :  { %158 = vsyncpa [#allocation3], 1 }

</bundles_post_ra>
